<compile_context>
chip_gen: v7x
topology: tpu7x:2x2x1
jax: 0.10.0
libtpu: 0.0.40
codegen_flags: <defaults>
</compile_context>

<pallas_src>
import functools

import jax
import jax.numpy as jnp
from jax.experimental import pallas as pl
from jax.experimental.pallas import tpu as pltpu

EPS = 1e-5  # PyTorch nn.LayerNorm default


def _round_up(x, m):
    return (x + m - 1) // m * m


def _detect_pipeline_mode():
    try:
        pl.BlockSpec((8, 128), lambda i: (0, 0), pipeline_mode=pl.Buffered(1))
        return True
    except Exception:
        return False


_HAS_PIPELINE_MODE = _detect_pipeline_mode()


def _vmem_capacity_bytes():
    """Generation-aware VMEM capacity (v5e/v6e 128 MiB, v7x 64 MiB)."""
    try:
        return int(pltpu.get_tpu_info().vmem_capacity_bytes)
    except Exception:
        return 64 * 1024 * 1024  # conservative (v7x) fallback


def _num_tensorcores():
    """Best-effort TensorCore count (v7x = 2); 1 if unknown."""
    try:
        info = pltpu.get_tpu_info()
        for name in ("num_cores", "core_count", "num_tensorcores", "cores"):
            v = getattr(info, name, None)
            if isinstance(v, int) and v > 0:
                return v
    except Exception:
        pass
    return 1


# --------------------------------------------------------------------------
# Kernels
# --------------------------------------------------------------------------
def _layernorm_store(y, g_ref, beta_ref, o_ref, *, inv_n, n_valid):
    """LayerNorm over the last dim of f32 `y`, then scale/shift and store."""
    mean = jnp.sum(y, axis=-1, keepdims=True) * inv_n
    yc = y - mean
    if n_valid != y.shape[-1]:
        # Feature dim is lane-padded: padded lanes hold -mean after centering
        # and must not pollute the variance.  Only emitted when padding
        # actually exists (streamed path with N not a multiple of 128).
        lane = jax.lax.broadcasted_iota(jnp.int32, y.shape, y.ndim - 1)
        yc = jnp.where(lane < n_valid, yc, 0.0)
    var = jnp.sum(yc * yc, axis=-1, keepdims=True) * inv_n   # biased variance
    inv_std = jax.lax.rsqrt(var + EPS)
    out = (yc * inv_std * g_ref[...].astype(jnp.float32)
           + beta_ref[...].astype(jnp.float32))
    o_ref[...] = out.astype(o_ref.dtype)


def _skip_fc_kernel_resident(x_ref, w_ref, b_ref, g_ref, beta_ref, o_ref, *,
                             inv_n, n_valid):
    """Resident-weight path: out = LN(x + relu(x @ w + b)) for one batch tile."""
    x = x_ref[...]
    h = jnp.dot(x, w_ref[...], preferred_element_type=jnp.float32)
    h = jnp.maximum(h + b_ref[...].astype(jnp.float32), 0.0)     # bias + ReLU
    y = x.astype(jnp.float32) + h                                 # residual add
    _layernorm_store(y, g_ref, beta_ref, o_ref, inv_n=inv_n, n_valid=n_valid)


def _skip_fc_kernel_stream(x_res_ref, xk_ref, w_ref, b_ref, g_ref, beta_ref,
                           o_ref, acc_ref, *, inv_n, n_valid):
    """Streamed-weight path: accumulate x-chunk @ w-slice over the K grid axis,
    run the ReLU/residual/LayerNorm epilogue on the last K step."""
    k = pl.program_id(1)

    @pl.when(k == 0)
    def _():
        acc_ref[...] = jnp.zeros_like(acc_ref)

    acc_ref[...] += jnp.dot(xk_ref[...], w_ref[...],
                            preferred_element_type=jnp.float32)

    @pl.when(k == pl.num_programs(1) - 1)
    def _():
        h = jnp.maximum(acc_ref[...] + b_ref[...].astype(jnp.float32), 0.0)
        y = x_res_ref[...].astype(jnp.float32) + h
        _layernorm_store(y, g_ref, beta_ref, o_ref, inv_n=inv_n,
                         n_valid=n_valid)


# --------------------------------------------------------------------------
# Wrapper
# --------------------------------------------------------------------------
def prepare_params(weight, bias, gamma, beta, dtype=None):
    """One-time parameter prep (hoisted out of the per-forward path).

    * Transposes the PyTorch (out, in) weight to (in, out) so kernels compute
      x @ w directly.
    * Casts all params to `dtype` (must match the activation dtype; bf16
      halves resident-weight VMEM and keeps the native bf16 MXU path).
    * Pads the feature dim to a multiple of 128 lanes only when N > 128 and
      not already aligned (needed for the streamed-contraction path; N <= 128
      uses full-width blocks and needs no padding at all).
    Returns (w_t, bias_row, gamma_row, beta_row, n_valid).
    """
    weight = jnp.asarray(weight)
    N = weight.shape[0]
    if dtype is None:
        dtype = weight.dtype
    Np = _round_up(N, 128) if N > 128 else N

    w_t = weight.T.astype(dtype)
    bias = jnp.asarray(bias).astype(dtype)
    gamma = jnp.asarray(gamma).astype(dtype)
    beta = jnp.asarray(beta).astype(dtype)

    pad = Np - N
    if pad:
        w_t = jnp.pad(w_t, ((0, pad), (0, pad)))
        bias = jnp.pad(bias, (0, pad))
        gamma = jnp.pad(gamma, (0, pad))
        beta = jnp.pad(beta, (0, pad))
    return (w_t, bias.reshape(1, Np), gamma.reshape(1, Np),
            beta.reshape(1, Np), N)


def _const_spec(shape, single_buffer):
    """BlockSpec for a grid-invariant operand on the 1-D (resident) grid.
    Single-buffered when pipeline_mode is supported (halves weight VMEM)."""
    ndim = len(shape)
    index_map = lambda i: (0,) * ndim
    if single_buffer and _HAS_PIPELINE_MODE:
        return pl.BlockSpec(shape, index_map, pipeline_mode=pl.Buffered(1))
    return pl.BlockSpec(shape, index_map)


def skip_fc_layer(x, w_t, bias_row, gamma_row, beta_row, n_valid, *,
                  block_rows=256, single_buffer_consts=True,
                  force_stream_tk=None):
    """Fused LayerNorm(x + relu(x @ w_t + b)).

    x: (B, N) or (B, Np) if the caller keeps activations lane-padded across
    layers.  Params must come from prepare_params(); x.dtype must match
    w_t.dtype (mixed dtypes would silently drop off the fast MXU path).
    """
    B = x.shape[0]
    Np = w_t.shape[0]
    N = n_valid
    assert w_t.shape == (Np, Np)
    assert x.shape[1] in (N, Np), f"x width {x.shape[1]} not in ({N}, {Np})"
    assert x.dtype == w_t.dtype, (
        f"x.dtype={x.dtype} must match weight dtype {w_t.dtype}; "
        "use prepare_params(dtype=...)")

    itemsize = jnp.dtype(x.dtype).itemsize
    sub = {4: 8, 2: 16, 1: 32}.get(itemsize, 8)   # sublane packing per dtype

    cap = _vmem_capacity_bytes()
    budget = int(cap * 0.7)                        # leave compiler headroom

    # ---- batch tiling -----------------------------------------------------
    bm = min(_round_up(block_rows, sub), _round_up(B, sub))
    n_cores = _num_tensorcores()
    if n_cores > 1:
        per_core = _round_up(pl.cdiv(B, n_cores), sub)
        if per_core >= 128:   # only split when each TensorCore gets a real tile
            bm = min(bm, per_core)
    Bp = _round_up(B, bm)

    # Feature / batch padding (no-ops in the common resident case).
    if x.shape[1] != Np:
        x = jnp.pad(x, ((0, 0), (0, Np - x.shape[1])))
    if Bp != B:
        x = jnp.pad(x, ((0, Bp - B), (0, 0)))

    inv_n = float(1.0 / N)
    small_bytes = 3 * 2 * Np * 4 + (1 << 16)       # bias/gamma/beta + slack
    out_bytes = 2 * bm * Np * itemsize             # double-buffered out tile
    epi_bytes = 3 * bm * Np * 4                    # f32 epilogue temporaries

    # ---- path selection: resident weight vs. streamed contraction ----------
    w_factor = 1 if (single_buffer_consts and _HAS_PIPELINE_MODE) else 2
    resident_need = (Np * Np * itemsize * w_factor
                     + 2 * bm * Np * itemsize       # double-buffered x tile
                     + out_bytes + epi_bytes + small_bytes)
    use_stream = (force_stream_tk is not None or resident_need > budget)
    use_stream = use_stream and (Np % 128 == 0)     # streaming needs 128-aligned K

    if use_stream:
        if force_stream_tk is not None:
            tk = int(force_stream_tk)
        else:
            tk = 128
            for cand in range(Np, 127, -128):       # largest 128-mult divisor fitting
                if Np % cand:
                    continue
                cand_need = (2 * cand * Np * itemsize     # streamed weight slices
                             + 2 * bm * cand * itemsize   # x contraction chunk
                             + 2 * bm * Np * itemsize     # x residual tile
                             + bm * Np * 4                # f32 accumulator
                             + out_bytes + epi_bytes + small_bytes)
                if cand_need <= budget:
                    tk = cand
                    break
        assert Np % tk == 0 and tk % 128 == 0
        num_k = Np // tk
        need = (2 * tk * Np * itemsize + 2 * bm * tk * itemsize
                + 2 * bm * Np * itemsize + bm * Np * 4
                + out_bytes + epi_bytes + small_bytes)

        kernel = functools.partial(_skip_fc_kernel_stream,
                                   inv_n=inv_n, n_valid=N)
        grid = (Bp // bm, num_k)
        in_specs = [
            pl.BlockSpec((bm, Np), lambda i, k: (i, 0)),   # x residual (per-i)
            pl.BlockSpec((bm, tk), lambda i, k: (i, k)),   # x contraction chunk
            pl.BlockSpec((tk, Np), lambda i, k: (k, 0)),   # streamed weight slice
            pl.BlockSpec((1, Np), lambda i, k: (0, 0)),    # bias
            pl.BlockSpec((1, Np), lambda i, k: (0, 0)),    # gamma
            pl.BlockSpec((1, Np), lambda i, k: (0, 0)),    # beta
        ]
        out_spec = pl.BlockSpec((bm, Np), lambda i, k: (i, 0))
        scratch = [pltpu.VMEM((bm, Np), jnp.float32)]
        dim_sem = ("parallel", "arbitrary")
        operands = (x, x, w_t, bias_row, gamma_row, beta_row)
    else:
        need = resident_need
        kernel = functools.partial(_skip_fc_kernel_resident,
                                   inv_n=inv_n, n_valid=N)
        grid = (Bp // bm,)
        in_specs = [
            pl.BlockSpec((bm, Np), lambda i: (i, 0)),               # x tile
            _const_spec((Np, Np), single_buffer_consts),            # weight
            _const_spec((1, Np), single_buffer_consts),             # bias
            _const_spec((1, Np), single_buffer_consts),             # gamma
            _const_spec((1, Np), single_buffer_consts),             # beta
        ]
        out_spec = pl.BlockSpec((bm, Np), lambda i: (i, 0))
        scratch = []
        dim_sem = ("parallel",)
        operands = (x, w_t, bias_row, gamma_row, beta_row)

    # Generation-aware VMEM limit: trigger at the smallest scoped default
    # (v5e, 16 MiB) and never exceed the chip's physical capacity.
    vmem_limit = None
    if need > 16 * 1024 * 1024:
        vmem_limit = int(min(max(need * 1.2, 32 * 1024 * 1024), cap * 0.95))

    out = pl.pallas_call(
        kernel,
        out_shape=jax.ShapeDtypeStruct((Bp, Np), x.dtype),
        grid_spec=pltpu.PrefetchScalarGridSpec(
            num_scalar_prefetch=0,
            grid=grid,
            in_specs=in_specs,
            out_specs=out_spec,
            scratch_shapes=scratch),
        compiler_params=pltpu.CompilerParams(
            dimension_semantics=dim_sem,
            vmem_limit_bytes=vmem_limit),
    )(*operands)

    if Bp != B or Np != N:
        out = out[:B, :N]
    return out


def skip_fc_ref(x, weight, bias, gamma, beta):
    h = jnp.maximum(x @ weight.T + bias, 0.0)
    y = x + h
    mean = jnp.mean(y, axis=-1, keepdims=True)
    var = jnp.mean((y - mean) ** 2, axis=-1, keepdims=True)
    return (y - mean) / jnp.sqrt(var + EPS) * gamma + beta


if __name__ == "__main__":
    num_units = 32
    batch = 16

    key = jax.random.PRNGKey(0)
    kx, kw, kb, kx2, kw2, kb2 = jax.random.split(key, 6)

    # nn.Linear default init: U(-1/sqrt(fan_in), 1/sqrt(fan_in)).
    bound = 1.0 / (num_units ** 0.5)
    weight = jax.random.uniform(kw, (num_units, num_units),
                                minval=-bound, maxval=bound, dtype=jnp.float32)
    bias = jax.random.uniform(kb, (num_units,),
                              minval=-bound, maxval=bound, dtype=jnp.float32)
    gamma = jnp.ones((num_units,), jnp.float32)   # LayerNorm default affine
    beta = jnp.zeros((num_units,), jnp.float32)
    x = jax.random.normal(kx, (batch, num_units), dtype=jnp.float32)

    # One-time parameter prep (transpose + dtype + optional padding).
    w_t, b_p, g_p, bt_p, n_valid = prepare_params(weight, bias, gamma, beta,
                                                  dtype=jnp.float32)

    def run(**kw):
        return jax.block_until_ready(
            skip_fc_layer(x, w_t, b_p, g_p, bt_p, n_valid, **kw))

    try:
        out_resident = run()             # resident-weight path, single batch tile
        out_tiled = run(block_rows=8)    # multi-step batch grid (pipelining)
    except Exception:
        # Fallback if this Pallas build mishandles pipeline_mode=pl.Buffered(1).
        out_resident = run(single_buffer_consts=False)
        out_tiled = run(block_rows=8, single_buffer_consts=False)

    ref = skip_fc_ref(x, weight, bias, gamma, beta)
    assert out_resident.shape == (batch, num_units)
    assert jnp.allclose(out_resident, ref, atol=1e-5, rtol=1e-5)
    assert jnp.allclose(out_tiled, ref, atol=1e-5, rtol=1e-5)

    # Exercise the weight-streaming (K-grid) path on a 128-aligned width.
    n_units2, batch2 = 256, 32
    bound2 = 1.0 / (n_units2 ** 0.5)
    weight2 = jax.random.uniform(kw2, (n_units2, n_units2), minval=-bound2,
                                 maxval=bound2, dtype=jnp.float32)
    bias2 = jax.random.uniform(kb2, (n_units2,), minval=-bound2, maxval=bound2,
                               dtype=jnp.float32)
    gamma2 = jnp.ones((n_units2,), jnp.float32)
    beta2 = jnp.zeros((n_units2,), jnp.float32)
    x2 = jax.random.normal(kx2, (batch2, n_units2), dtype=jnp.float32)

    w2_t, b2_p, g2_p, bt2_p, nv2 = prepare_params(weight2, bias2, gamma2, beta2)
    out_stream = jax.block_until_ready(
        skip_fc_layer(x2, w2_t, b2_p, g2_p, bt2_p, nv2, force_stream_tk=128))
    ref2 = skip_fc_ref(x2, weight2, bias2, gamma2, beta2)
    assert out_stream.shape == (batch2, n_units2)
    assert jnp.allclose(out_stream, ref2, atol=1e-4, rtol=1e-4)

    print("KERNEL_OK")
</pallas_src>

<mosaic_0001>
module attributes {stable_mosaic.version = 11 : i64} {
  func.func @_skip_fc_kernel_resident(%arg0: i32, %arg1: memref<16x32xf32, #tpu.memory_space<vmem>>, %arg2: memref<32x32xf32, #tpu.memory_space<vmem>>, %arg3: memref<1x32xf32, #tpu.memory_space<vmem>>, %arg4: memref<1x32xf32, #tpu.memory_space<vmem>>, %arg5: memref<1x32xf32, #tpu.memory_space<vmem>>, %arg6: memref<16x32xf32, #tpu.memory_space<vmem>>) attributes {dimension_semantics = [#tpu.dimension_semantics<parallel>], iteration_bounds = array<i64: 1>, scalar_prefetch = 0 : i64, scratch_operands = 0 : i64, tpu.core_type = #tpu.core_type<tc>, window_params = [{transform_indices = @transform_0, window_bounds = array<i64: 16, 32>}, {pipeline_mode = #tpu.pipeline_mode<synchronous>, transform_indices = @transform_1, window_bounds = array<i64: 32, 32>}, {pipeline_mode = #tpu.pipeline_mode<synchronous>, transform_indices = @transform_2, window_bounds = array<i64: 1, 32>}, {pipeline_mode = #tpu.pipeline_mode<synchronous>, transform_indices = @transform_3, window_bounds = array<i64: 1, 32>}, {pipeline_mode = #tpu.pipeline_mode<synchronous>, transform_indices = @transform_4, window_bounds = array<i64: 1, 32>}, {transform_indices = @transform_5, window_bounds = array<i64: 16, 32>}]} {
    %c0 = arith.constant 0 : index
    %c0_0 = arith.constant 0 : index
    %0 = vector.load %arg1[%c0, %c0_0] : memref<16x32xf32, #tpu.memory_space<vmem>>, vector<16x32xf32>
    %c0_1 = arith.constant 0 : index
    %c0_2 = arith.constant 0 : index
    %1 = vector.load %arg2[%c0_1, %c0_2] : memref<32x32xf32, #tpu.memory_space<vmem>>, vector<32x32xf32>
    %cst = arith.constant dense<0.000000e+00> : vector<16x32xf32>
    %2 = tpu.matmul %0, %1, %cst {dimension_numbers = #tpu.dot_dimension_numbers<[1], [0], [0], [1], [0, 0, 1, 1], [], []>} : vector<16x32xf32>, vector<32x32xf32>, vector<16x32xf32> -> vector<16x32xf32>
    %c0_3 = arith.constant 0 : index
    %c0_4 = arith.constant 0 : index
    %3 = vector.load %arg3[%c0_3, %c0_4] : memref<1x32xf32, #tpu.memory_space<vmem>>, vector<1x32xf32>
    %4 = vector.broadcast %3 : vector<1x32xf32> to vector<16x32xf32>
    %5 = arith.addf %2, %4 : vector<16x32xf32>
    %cst_5 = arith.constant 0.000000e+00 : f32
    %6 = vector.broadcast %cst_5 : f32 to vector<16x32xf32>
    %7 = arith.maximumf %5, %6 : vector<16x32xf32>
    %8 = arith.addf %0, %7 : vector<16x32xf32>
    %cst_6 = arith.constant dense<0.000000e+00> : vector<16xf32>
    %9 = vector.multi_reduction <add>, %8, %cst_6 [1] : vector<16x32xf32> to vector<16xf32>
    %10 = vector.shape_cast %9 : vector<16xf32> to vector<16x1xf32>
    %cst_7 = arith.constant 3.125000e-02 : f32
    %11 = vector.broadcast %cst_7 : f32 to vector<16x1xf32>
    %12 = arith.mulf %10, %11 : vector<16x1xf32>
    %13 = vector.broadcast %12 : vector<16x1xf32> to vector<16x32xf32>
    %14 = arith.subf %8, %13 : vector<16x32xf32>
    %15 = arith.mulf %14, %14 : vector<16x32xf32>
    %cst_8 = arith.constant dense<0.000000e+00> : vector<16xf32>
    %16 = vector.multi_reduction <add>, %15, %cst_8 [1] : vector<16x32xf32> to vector<16xf32>
    %17 = vector.shape_cast %16 : vector<16xf32> to vector<16x1xf32>
    %cst_9 = arith.constant 3.125000e-02 : f32
    %18 = vector.broadcast %cst_9 : f32 to vector<16x1xf32>
    %19 = arith.mulf %17, %18 : vector<16x1xf32>
    %cst_10 = arith.constant 9.99999974E-6 : f32
    %20 = vector.broadcast %cst_10 : f32 to vector<16x1xf32>
    %21 = arith.addf %19, %20 : vector<16x1xf32>
    %22 = math.rsqrt %21 : vector<16x1xf32>
    %23 = vector.broadcast %22 : vector<16x1xf32> to vector<16x32xf32>
    %24 = arith.mulf %14, %23 : vector<16x32xf32>
    %c0_11 = arith.constant 0 : index
    %c0_12 = arith.constant 0 : index
    %25 = vector.load %arg4[%c0_11, %c0_12] : memref<1x32xf32, #tpu.memory_space<vmem>>, vector<1x32xf32>
    %26 = vector.broadcast %25 : vector<1x32xf32> to vector<16x32xf32>
    %27 = arith.mulf %24, %26 : vector<16x32xf32>
    %c0_13 = arith.constant 0 : index
    %c0_14 = arith.constant 0 : index
    %28 = vector.load %arg5[%c0_13, %c0_14] : memref<1x32xf32, #tpu.memory_space<vmem>>, vector<1x32xf32>
    %29 = vector.broadcast %28 : vector<1x32xf32> to vector<16x32xf32>
    %30 = arith.addf %27, %29 : vector<16x32xf32>
    %c0_15 = arith.constant 0 : index
    %c0_16 = arith.constant 0 : index
    %31 = vector.load %arg6[%c0_15, %c0_16] : memref<16x32xf32, #tpu.memory_space<vmem>>, vector<16x32xf32>
    tpu.vector_store %arg6[%c0_15, %c0_16], %30 {strides = array<i32>} : memref<16x32xf32, #tpu.memory_space<vmem>>, vector<16x32xf32>,
    return
  }
  func.func @transform_0(%arg0: i32) -> (i32, i32) {
    %c0_i32 = arith.constant 0 : i32
    %c0_i32_0 = arith.constant 0 : i32
    return %arg0, %c0_i32 : i32, i32
  }
  func.func @transform_1(%arg0: i32) -> (i32, i32) {
    %c0_i32 = arith.constant 0 : i32
    %c0_i32_0 = arith.constant 0 : i32
    %c0_i32_1 = arith.constant 0 : i32
    return %c0_i32, %c0_i32_0 : i32, i32
  }
  func.func @transform_2(%arg0: i32) -> (i32, i32) {
    %c0_i32 = arith.constant 0 : i32
    %c0_i32_0 = arith.constant 0 : i32
    %c0_i32_1 = arith.constant 0 : i32
    return %c0_i32, %c0_i32_0 : i32, i32
  }
  func.func @transform_3(%arg0: i32) -> (i32, i32) {
    %c0_i32 = arith.constant 0 : i32
    %c0_i32_0 = arith.constant 0 : i32
    %c0_i32_1 = arith.constant 0 : i32
    return %c0_i32, %c0_i32_0 : i32, i32
  }
  func.func @transform_4(%arg0: i32) -> (i32, i32) {
    %c0_i32 = arith.constant 0 : i32
    %c0_i32_0 = arith.constant 0 : i32
    %c0_i32_1 = arith.constant 0 : i32
    return %c0_i32, %c0_i32_0 : i32, i32
  }
  func.func @transform_5(%arg0: i32) -> (i32, i32) {
    %c0_i32 = arith.constant 0 : i32
    %c0_i32_0 = arith.constant 0 : i32
    return %arg0, %c0_i32 : i32, i32
  }
}

module attributes {stable_mosaic.version = 11 : i64} {
  func.func @_skip_fc_kernel_resident(%arg0: i32, %arg1: memref<16x32xf32, #tpu.memory_space<vmem>>, %arg2: memref<32x32xf32, #tpu.memory_space<vmem>>, %arg3: memref<1x32xf32, #tpu.memory_space<vmem>>, %arg4: memref<1x32xf32, #tpu.memory_space<vmem>>, %arg5: memref<1x32xf32, #tpu.memory_space<vmem>>, %arg6: memref<16x32xf32, #tpu.memory_space<vmem>>) attributes {dimension_semantics = [#tpu.dimension_semantics<parallel>], iteration_bounds = array<i64: 1>, scalar_prefetch = 0 : i64, scratch_operands = 0 : i64, tpu.core_type = #tpu.core_type<tc>, window_params = [{transform_indices = @transform_0, window_bounds = array<i64: 16, 32>}, {pipeline_mode = #tpu.pipeline_mode<synchronous>, transform_indices = @transform_1, window_bounds = array<i64: 32, 32>}, {pipeline_mode = #tpu.pipeline_mode<synchronous>, transform_indices = @transform_2, window_bounds = array<i64: 1, 32>}, {pipeline_mode = #tpu.pipeline_mode<synchronous>, transform_indices = @transform_3, window_bounds = array<i64: 1, 32>}, {pipeline_mode = #tpu.pipeline_mode<synchronous>, transform_indices = @transform_4, window_bounds = array<i64: 1, 32>}, {transform_indices = @transform_5, window_bounds = array<i64: 16, 32>}]} {
    %c0 = arith.constant 0 : index
    %c0_0 = arith.constant 0 : index
    %0 = vector.load %arg1[%c0, %c0_0] : memref<16x32xf32, #tpu.memory_space<vmem>>, vector<16x32xf32>
    %c0_1 = arith.constant 0 : index
    %c0_2 = arith.constant 0 : index
    %1 = vector.load %arg2[%c0_1, %c0_2] : memref<32x32xf32, #tpu.memory_space<vmem>>, vector<32x32xf32>
    %cst = arith.constant dense<0.000000e+00> : vector<16x32xf32>
    %2 = tpu.matmul %0, %1, %cst {dimension_numbers = #tpu.dot_dimension_numbers<[1], [0], [0], [1], [0, 0, 1, 1], [], []>} : vector<16x32xf32>, vector<32x32xf32>, vector<16x32xf32> -> vector<16x32xf32>
    %c0_3 = arith.constant 0 : index
    %c0_4 = arith.constant 0 : index
    %3 = vector.load %arg3[%c0_3, %c0_4] : memref<1x32xf32, #tpu.memory_space<vmem>>, vector<1x32xf32>
    %4 = vector.broadcast %3 : vector<1x32xf32> to vector<16x32xf32>
    %5 = arith.addf %2, %4 : vector<16x32xf32>
    %cst_5 = arith.constant 0.000000e+00 : f32
    %6 = vector.broadcast %cst_5 : f32 to vector<16x32xf32>
    %7 = arith.maximumf %5, %6 : vector<16x32xf32>
    %8 = arith.addf %0, %7 : vector<16x32xf32>
    %cst_6 = arith.constant dense<0.000000e+00> : vector<16xf32>
    %9 = vector.multi_reduction <add>, %8, %cst_6 [1] : vector<16x32xf32> to vector<16xf32>
    %10 = vector.shape_cast %9 : vector<16xf32> to vector<16x1xf32>
    %cst_7 = arith.constant 3.125000e-02 : f32
    %11 = vector.broadcast %cst_7 : f32 to vector<16x1xf32>
    %12 = arith.mulf %10, %11 : vector<16x1xf32>
    %13 = vector.broadcast %12 : vector<16x1xf32> to vector<16x32xf32>
    %14 = arith.subf %8, %13 : vector<16x32xf32>
    %15 = arith.mulf %14, %14 : vector<16x32xf32>
    %cst_8 = arith.constant dense<0.000000e+00> : vector<16xf32>
    %16 = vector.multi_reduction <add>, %15, %cst_8 [1] : vector<16x32xf32> to vector<16xf32>
    %17 = vector.shape_cast %16 : vector<16xf32> to vector<16x1xf32>
    %cst_9 = arith.constant 3.125000e-02 : f32
    %18 = vector.broadcast %cst_9 : f32 to vector<16x1xf32>
    %19 = arith.mulf %17, %18 : vector<16x1xf32>
    %cst_10 = arith.constant 9.99999974E-6 : f32
    %20 = vector.broadcast %cst_10 : f32 to vector<16x1xf32>
    %21 = arith.addf %19, %20 : vector<16x1xf32>
    %22 = math.rsqrt %21 : vector<16x1xf32>
    %23 = vector.broadcast %22 : vector<16x1xf32> to vector<16x32xf32>
    %24 = arith.mulf %14, %23 : vector<16x32xf32>
    %c0_11 = arith.constant 0 : index
    %c0_12 = arith.constant 0 : index
    %25 = vector.load %arg4[%c0_11, %c0_12] : memref<1x32xf32, #tpu.memory_space<vmem>>, vector<1x32xf32>
    %26 = vector.broadcast %25 : vector<1x32xf32> to vector<16x32xf32>
    %27 = arith.mulf %24, %26 : vector<16x32xf32>
    %c0_13 = arith.constant 0 : index
    %c0_14 = arith.constant 0 : index
    %28 = vector.load %arg5[%c0_13, %c0_14] : memref<1x32xf32, #tpu.memory_space<vmem>>, vector<1x32xf32>
    %29 = vector.broadcast %28 : vector<1x32xf32> to vector<16x32xf32>
    %30 = arith.addf %27, %29 : vector<16x32xf32>
    %c0_15 = arith.constant 0 : index
    %c0_16 = arith.constant 0 : index
    %31 = vector.load %arg6[%c0_15, %c0_16] : memref<16x32xf32, #tpu.memory_space<vmem>>, vector<16x32xf32>
    tpu.vector_store %arg6[%c0_15, %c0_16], %30 {strides = array<i32>} : memref<16x32xf32, #tpu.memory_space<vmem>>, vector<16x32xf32>,
    return
  }
  func.func @transform_0(%arg0: i32) -> (i32, i32) {
    %c0_i32 = arith.constant 0 : i32
    %c0_i32_0 = arith.constant 0 : i32
    return %arg0, %c0_i32 : i32, i32
  }
  func.func @transform_1(%arg0: i32) -> (i32, i32) {
    %c0_i32 = arith.constant 0 : i32
    %c0_i32_0 = arith.constant 0 : i32
    %c0_i32_1 = arith.constant 0 : i32
    return %c0_i32, %c0_i32_0 : i32, i32
  }
  func.func @transform_2(%arg0: i32) -> (i32, i32) {
    %c0_i32 = arith.constant 0 : i32
    %c0_i32_0 = arith.constant 0 : i32
    %c0_i32_1 = arith.constant 0 : i32
    return %c0_i32, %c0_i32_0 : i32, i32
  }
  func.func @transform_3(%arg0: i32) -> (i32, i32) {
    %c0_i32 = arith.constant 0 : i32
    %c0_i32_0 = arith.constant 0 : i32
    %c0_i32_1 = arith.constant 0 : i32
    return %c0_i32, %c0_i32_0 : i32, i32
  }
  func.func @transform_4(%arg0: i32) -> (i32, i32) {
    %c0_i32 = arith.constant 0 : i32
    %c0_i32_0 = arith.constant 0 : i32
    %c0_i32_1 = arith.constant 0 : i32
    return %c0_i32, %c0_i32_0 : i32, i32
  }
  func.func @transform_5(%arg0: i32) -> (i32, i32) {
    %c0_i32 = arith.constant 0 : i32
    %c0_i32_0 = arith.constant 0 : i32
    return %arg0, %c0_i32 : i32, i32
  }
}

</mosaic_0001>

<bundles_post_ra>
// kernel: tpu_custom_call.1
= control target key start
LH: loop header
LB: loop body
LE: loop exit
PB: predicated region body
PF: predicated region fallthrough
CT: control target
= control target key end

     0   :  { %10 = vsyncpa [#allocation3], 0  ;;  %s420_s0 = inlined_call_operand.hbm [shape: f32[16,32], index: 0, kind: input, shape index: {}]   ;;  %s421_s1 = inlined_call_operand.hbm [shape: f32[32,32], index: 1, kind: input, shape index: {}]   ;;  %s422_s2 = inlined_call_operand.vmem [shape: f32[1,32], index: 2, kind: input, shape index: {}]   ;;  %s423_s3 = inlined_call_operand.vmem [shape: f32[1,32], index: 3, kind: input, shape index: {}]   ;;  %s424_s4 = inlined_call_operand.vmem [shape: f32[1,32], index: 4, kind: input, shape index: {}]   ;;  %s425_s5 = inlined_call_operand.hbm [shape: f32[16,32], index: 5, kind: output, shape index: {}]  }
   0x1   :  { %11 = vsyncpa [#allocation6], 0 }
   0x2   :  { %12 = vsyncpa [#allocation4], 0  ;;  %s323_s18 = smov [#allocation2]   ;;  %s251_s22 = scalar_lea.hbm %s420_s0, 256 }
   0x3   :  { %s18_s19 = sshll.u32 %s323_s18, 4  ;;  %p252_p0 = scmp.ne.s32.totalorder %s420_s0, %s251_s22  ;;  %s19_s19 = int_to_ptr.vmem [resolvable:$true] %s18_s19 }
   0x4   :  { %p255_p1 = scmp.lt.u32.totalorder %s251_s22, %s420_s0 }
   0x6   :  { %p257_p2 = pnand %p255_p1, %p252_p0 }
   0x8   :  { %260 = shalt.err (!%p257_p2)
}
   0x9   :  { %s261_s27 = scalar_lea.vmem %s19_s19, 256  ;;  %p266_p4 = scmp.lt.s32.totalorder %s19_s19, %s19_s19 }
   0xa   :  { %p262_p3 = scmp.ne.s32.totalorder %s19_s19, %s261_s27  ;;  %p267_p5 = scmp.lt.s32.totalorder %s261_s27, %s261_s27 }
   0xc   :  { %p268_p6 = por %p267_p5, %p266_p4 }
   0xe   :  { %p269_p7 = pnand %p268_p6, %p262_p3 }
  0x10   :  { %272 = shalt.err (!%p269_p7)
}
  0x11   :  { %s324_s28 = smov 128   ;;  %s325_s29 = smov 8  }
  0x12   :  { %24 = dma.hbm_to_vmem [thread:$0]  %s420_s0, 256, %s19_s19, [#allocation3], %s324_s28, %s324_s28, %s325_s29  }
  0x13   :  { %s326_s7 = smov [#allocation5]   ;;  %s273_s11 = scalar_lea.hbm %s421_s1, 512 }
  0x14   :  { %s30_s8 = sshll.u32 %s326_s7, 4  ;;  %p274_p8 = scmp.ne.s32.totalorder %s421_s1, %s273_s11  ;;  %s31_s8 = int_to_ptr.vmem [resolvable:$true] %s30_s8 }
  0x15   :  { %p277_p9 = scmp.lt.u32.totalorder %s273_s11, %s421_s1 }
  0x17   :  { %p279_p10 = pnand %p277_p9, %p274_p8 }
  0x19   :  { %282 = shalt.err (!%p279_p10)
}
  0x1a   :  { %s283_s16 = scalar_lea.vmem %s31_s8, 512  ;;  %p288_p12 = scmp.lt.s32.totalorder %s31_s8, %s31_s8 }
  0x1b   :  { %p284_p11 = scmp.ne.s32.totalorder %s31_s8, %s283_s16  ;;  %p289_p13 = scmp.lt.s32.totalorder %s283_s16, %s283_s16 }
  0x1d   :  { %p290_p0 = por %p289_p13, %p288_p12 }
  0x1f   :  { %p291_p1 = pnand %p290_p0, %p284_p11 }
  0x21   :  { %294 = shalt.err (!%p291_p1)
}
  0x22   :  { %36 = dma.hbm_to_vmem [thread:$0]  %s421_s1, 512, %s31_s8, [#allocation6], %s324_s28, %s324_s28, %s325_s29  }
  0x23   :  { %317 = dma.done.wait [#allocation3], 256  }
  0x24   :  { %318 = vsyncadd [#allocation3], 4294967040 }
  0x25   :  { %319 = dma.done.wait [#allocation6], 512  }
  0x26   :  { %320 = vsyncadd [#allocation6], 4294966784  ;;  %vm62_vm0 = vcmask 261120   ;;  %v51_v0 = vld [vmem:[#allocation5] sm:$0xff]  ;;  %v52_v1 = vld [vmem:[#allocation5 + $0x8] sm:$0xff]  ;;  %s327_s22 = smov [#allocation7]  }
  0x27   :  { %v53_v2 = vld [vmem:[#allocation5 + $0x10] sm:$0xff]  ;;  %v234_v3 = vpack.c.bf16 %v52_v1, %v51_v0  ;;  %v54_v4 = vld [vmem:[#allocation5 + $0x18] sm:$0xff]  ;;  %s199_s23 = sshll.u32 %s327_s22, 4  ;;  %s200_s23 = int_to_ptr.vmem [resolvable:$true] %s199_s23 }
  0x28   :  { %v49_v5 = vld [vmem:[#allocation2] sm:$0xff]  ;;  %v238_v6 = vpack.c.bf16 %v54_v4, %v53_v2  ;;  %v50_v7 = vld [vmem:[#allocation2 + $0x8] sm:$0xff]  ;;  %s295_s24 = scalar_lea.vmem %s200_s23, 256  ;;  %p300_p3 = scmp.lt.s32.totalorder %s200_s23, %s200_s23 }
  0x29   :  { %231 = vmatprep.mubr.msk.f32.mxu0 %vm62_vm0, %v49_v5  ;;  %235 = vmatprep.subr.bf16.mxu0 %v234_v3  ;;  %v212_v8 = vld [vmem:[%s422_s2] ss:$0 sm:$0xff]  ;;  %p296_p2 = scmp.ne.s32.totalorder %s200_s23, %s295_s24  ;;  %p301_p4 = scmp.lt.s32.totalorder %s295_s24, %s295_s24 }
  0x2a   :  { %237 = vmatpush3.bf16.msra.mxu0 %v234_v3  ;;  %v215_v36 = vld [vmem:[%s423_s3] ss:$0 sm:$0xff] }
  0x2b   :  { %239 = vmatprep.subr.bf16.mxu0 %v238_v6  ;;  %v216_v38 = vld [vmem:[%s424_s4] ss:$0 sm:$0xff]  ;;  %p302_p5 = por %p301_p4, %p300_p3 }
  0x2d   :  { %p303_p6 = pnand %p302_p5, %p296_p2 }
  0x2e   :  { %241 = vmatpush3.bf16.msra.mxu0 %v238_v6 }
  0x31   :  { %232 = vmatmul.mubr.msk.f32.vlgmr.msra.gmra.mrb[0].mxu0 %vm62_vm0, %v50_v7 }
 0x104   :  { %v233_v9 = vpop.f32.mrb[0].mxu0 }
 0x105   :  { %v141_v10 = vadd.f32 %v233_v9, %v212_v8  ;;  %v135_v11 = vpop.f32.mrb[1].mxu0 }
 0x106   :  { %v136_v12 = vadd.f32 %v212_v8, %v135_v11 }
 0x107   :  { %v145_v13 = vmax.f32 %v141_v10, 0.0 }
 0x108   :  { %v144_v14 = vmax.f32 %v136_v12, 0.0 }
 0x109   :  { %v147_v17 = vadd.f32 %v145_v13, %v50_v7 }
 0x10a   :  { %v146_v15 = vadd.f32 %v144_v14, %v49_v5 }
 0x10b   :  { %v151_v18 = vsel %vm62_vm0, %v147_v17, 0.0 }
 0x10c   :  { %v148_v16 = vsel %vm62_vm0, %v146_v15, 0.0 }
 0x10d   :  { %149 = vadd.xlane.f32.xlu0 %v148_v16 }
 0x111   :  { %152 = vadd.xlane.f32.xlu0 %v151_v18 }
 0x19a   :  { %v150_v19 = vpop.xlane.xlu0 %149 }
 0x19b   :  { %v154_v20 = vmul.f32 0.03125, %v150_v19 }
 0x19d   :  { %v156_v21 = vsub.f32 %v146_v15, %v154_v20 }
 0x19e   :  { %v153_v22 = vpop.xlane.xlu0 %152 }
 0x19f   :  { %v155_v23 = vmul.f32 0.03125, %v153_v22  ;;  %v158_v24 = vmul.f32 %v156_v21, %v156_v21 }
 0x1a1   :  { %v157_v25 = vsub.f32 %v147_v17, %v155_v23  ;;  %v160_v26 = vsel %vm62_vm0, %v158_v24, 0.0 }
 0x1a2   :  { %161 = vadd.xlane.f32.xlu1 %v160_v26 }
 0x1a3   :  { %v159_v27 = vmul.f32 %v157_v25, %v157_v25 }
 0x1a5   :  { %v163_v28 = vsel %vm62_vm0, %v159_v27, 0.0 }
 0x1a6   :  { %164 = vadd.xlane.f32.xlu1 %v163_v28 }
 0x22f   :  { %v162_v29 = vpop.xlane.xlu1 %161 }
 0x230   :  { %v166_v30 = vmul.f32 0.03125, %v162_v29 }
 0x232   :  { %v168_v31 = vadd.f32 1e-05, %v166_v30 }
 0x233   :  { %v165_v32 = vpop.xlane.xlu1 %164 }
 0x234   :  { %247 = vrsqrt.f32 %v168_v31  ;;  %v167_v33 = vmul.f32 0.03125, %v165_v32 }
 0x236   :  { %v169_v34 = vadd.f32 1e-05, %v167_v33 }
 0x238   :  { %249 = vrsqrt.f32 %v169_v34 }
 0x23e   :  { %v248_v35 = vpop.eup %247 }
 0x23f   :  { %v172_v37 = vmul.f32 %v248_v35, %v156_v21 }
 0x241   :  { %v181_v39 = vmul.f32 %v215_v36, %v172_v37 }
 0x242   :  { %v250_v40 = vpop.eup %249 }
 0x243   :  { %v173_v41 = vmul.f32 %v250_v40, %v157_v25  ;;  %v190_v42 = vadd.f32 %v216_v38, %v181_v39 }
 0x245   :  { %v182_v43 = vmul.f32 %v215_v36, %v173_v41  ;;  %192 = vst.msk [vmem:[#allocation7] sm:$0xff] %vm62_vm0, %v190_v42 }
 0x247   :  { %v191_v44 = vadd.f32 %v216_v38, %v182_v43 }
 0x249   :  { %193 = vst.msk [vmem:[#allocation7 + $0x8] sm:$0xff] %vm62_vm0, %v191_v44 }
 0x24a   :  { %306 = shalt.err (!%p303_p6)
}
 0x24b   :  { %s307_s25 = scalar_lea.hbm %s425_s5, 256 }
 0x24c   :  { %p308_p7 = scmp.ne.s32.totalorder %s425_s5, %s307_s25  ;;  %p311_p8 = scmp.lt.u32.totalorder %s307_s25, %s425_s5 }
 0x24e   :  { %p313_p9 = pnand %p311_p8, %p308_p7 }
 0x250   :  { %316 = shalt.err (!%p313_p9)
}
 0x251   :  { %205 = dma.vmem_to_hbm [thread:$0]  %s200_s23, 256, %s425_s5, [#allocation4], %s324_s28, %s324_s28, %s325_s29  }
 0x252   :  { %321 = dma.done.wait [#allocation4], 256  }
 0x253   :  { %322 = vsyncadd [#allocation4], 4294967040 }
 0x254   :  { %209 = vsyncpa [#allocation3], 1 }
 0x255   :  { %210 = vsyncpa [#allocation6], 1 }
 0x256   :  { %211 = vsyncpa [#allocation4], 1 }

// kernel: tpu_custom_call.1
= control target key start
LH: loop header
LB: loop body
LE: loop exit
PB: predicated region body
PF: predicated region fallthrough
CT: control target
= control target key end

     0   :  { %10 = vsyncpa [#allocation3], 0  ;;  %s420_s0 = inlined_call_operand.hbm [shape: f32[16,32], index: 0, kind: input, shape index: {}]   ;;  %s421_s1 = inlined_call_operand.hbm [shape: f32[32,32], index: 1, kind: input, shape index: {}]   ;;  %s422_s2 = inlined_call_operand.vmem [shape: f32[1,32], index: 2, kind: input, shape index: {}]   ;;  %s423_s3 = inlined_call_operand.vmem [shape: f32[1,32], index: 3, kind: input, shape index: {}]   ;;  %s424_s4 = inlined_call_operand.vmem [shape: f32[1,32], index: 4, kind: input, shape index: {}]   ;;  %s425_s5 = inlined_call_operand.hbm [shape: f32[16,32], index: 5, kind: output, shape index: {}]  }
   0x1   :  { %11 = vsyncpa [#allocation6], 0 }
   0x2   :  { %12 = vsyncpa [#allocation4], 0  ;;  %s323_s18 = smov [#allocation2]   ;;  %s251_s22 = scalar_lea.hbm %s420_s0, 256 }
   0x3   :  { %s18_s19 = sshll.u32 %s323_s18, 4  ;;  %p252_p0 = scmp.ne.s32.totalorder %s420_s0, %s251_s22  ;;  %s19_s19 = int_to_ptr.vmem [resolvable:$true] %s18_s19 }
   0x4   :  { %p255_p1 = scmp.lt.u32.totalorder %s251_s22, %s420_s0 }
   0x6   :  { %p257_p2 = pnand %p255_p1, %p252_p0 }
   0x8   :  { %260 = shalt.err (!%p257_p2)
}
   0x9   :  { %s261_s27 = scalar_lea.vmem %s19_s19, 256  ;;  %p266_p4 = scmp.lt.s32.totalorder %s19_s19, %s19_s19 }
   0xa   :  { %p262_p3 = scmp.ne.s32.totalorder %s19_s19, %s261_s27  ;;  %p267_p5 = scmp.lt.s32.totalorder %s261_s27, %s261_s27 }
   0xc   :  { %p268_p6 = por %p267_p5, %p266_p4 }
   0xe   :  { %p269_p7 = pnand %p268_p6, %p262_p3 }
  0x10   :  { %272 = shalt.err (!%p269_p7)
}
  0x11   :  { %s324_s28 = smov 128   ;;  %s325_s29 = smov 8  }
  0x12   :  { %24 = dma.hbm_to_vmem [thread:$0]  %s420_s0, 256, %s19_s19, [#allocation3], %s324_s28, %s324_s28, %s325_s29  }
  0x13   :  { %s326_s7 = smov [#allocation5]   ;;  %s273_s11 = scalar_lea.hbm %s421_s1, 512 }
  0x14   :  { %s30_s8 = sshll.u32 %s326_s7, 4  ;;  %p274_p8 = scmp.ne.s32.totalorder %s421_s1, %s273_s11  ;;  %s31_s8 = int_to_ptr.vmem [resolvable:$true] %s30_s8 }
  0x15   :  { %p277_p9 = scmp.lt.u32.totalorder %s273_s11, %s421_s1 }
  0x17   :  { %p279_p10 = pnand %p277_p9, %p274_p8 }
  0x19   :  { %282 = shalt.err (!%p279_p10)
}
  0x1a   :  { %s283_s16 = scalar_lea.vmem %s31_s8, 512  ;;  %p288_p12 = scmp.lt.s32.totalorder %s31_s8, %s31_s8 }
  0x1b   :  { %p284_p11 = scmp.ne.s32.totalorder %s31_s8, %s283_s16  ;;  %p289_p13 = scmp.lt.s32.totalorder %s283_s16, %s283_s16 }
  0x1d   :  { %p290_p0 = por %p289_p13, %p288_p12 }
  0x1f   :  { %p291_p1 = pnand %p290_p0, %p284_p11 }
  0x21   :  { %294 = shalt.err (!%p291_p1)
}
  0x22   :  { %36 = dma.hbm_to_vmem [thread:$0]  %s421_s1, 512, %s31_s8, [#allocation6], %s324_s28, %s324_s28, %s325_s29  }
  0x23   :  { %317 = dma.done.wait [#allocation3], 256  }
  0x24   :  { %318 = vsyncadd [#allocation3], 4294967040 }
  0x25   :  { %319 = dma.done.wait [#allocation6], 512  }
  0x26   :  { %320 = vsyncadd [#allocation6], 4294966784  ;;  %vm62_vm0 = vcmask 261120   ;;  %v51_v0 = vld [vmem:[#allocation5] sm:$0xff]  ;;  %v52_v1 = vld [vmem:[#allocation5 + $0x8] sm:$0xff]  ;;  %s327_s22 = smov [#allocation7]  }
  0x27   :  { %v53_v2 = vld [vmem:[#allocation5 + $0x10] sm:$0xff]  ;;  %v234_v3 = vpack.c.bf16 %v52_v1, %v51_v0  ;;  %v54_v4 = vld [vmem:[#allocation5 + $0x18] sm:$0xff]  ;;  %s199_s23 = sshll.u32 %s327_s22, 4  ;;  %s200_s23 = int_to_ptr.vmem [resolvable:$true] %s199_s23 }
  0x28   :  { %v49_v5 = vld [vmem:[#allocation2] sm:$0xff]  ;;  %v238_v6 = vpack.c.bf16 %v54_v4, %v53_v2  ;;  %v50_v7 = vld [vmem:[#allocation2 + $0x8] sm:$0xff]  ;;  %s295_s24 = scalar_lea.vmem %s200_s23, 256  ;;  %p300_p3 = scmp.lt.s32.totalorder %s200_s23, %s200_s23 }
  0x29   :  { %231 = vmatprep.mubr.msk.f32.mxu0 %vm62_vm0, %v49_v5  ;;  %235 = vmatprep.subr.bf16.mxu0 %v234_v3  ;;  %v212_v8 = vld [vmem:[%s422_s2] ss:$0 sm:$0xff]  ;;  %p296_p2 = scmp.ne.s32.totalorder %s200_s23, %s295_s24  ;;  %p301_p4 = scmp.lt.s32.totalorder %s295_s24, %s295_s24 }
  0x2a   :  { %237 = vmatpush3.bf16.msra.mxu0 %v234_v3  ;;  %v215_v36 = vld [vmem:[%s423_s3] ss:$0 sm:$0xff] }
  0x2b   :  { %239 = vmatprep.subr.bf16.mxu0 %v238_v6  ;;  %v216_v38 = vld [vmem:[%s424_s4] ss:$0 sm:$0xff]  ;;  %p302_p5 = por %p301_p4, %p300_p3 }
  0x2d   :  { %p303_p6 = pnand %p302_p5, %p296_p2 }
  0x2e   :  { %241 = vmatpush3.bf16.msra.mxu0 %v238_v6 }
  0x31   :  { %232 = vmatmul.mubr.msk.f32.vlgmr.msra.gmra.mrb[0].mxu0 %vm62_vm0, %v50_v7 }
 0x104   :  { %v233_v9 = vpop.f32.mrb[0].mxu0 }
 0x105   :  { %v141_v10 = vadd.f32 %v233_v9, %v212_v8  ;;  %v135_v11 = vpop.f32.mrb[1].mxu0 }
 0x106   :  { %v136_v12 = vadd.f32 %v212_v8, %v135_v11 }
 0x107   :  { %v145_v13 = vmax.f32 %v141_v10, 0.0 }
 0x108   :  { %v144_v14 = vmax.f32 %v136_v12, 0.0 }
 0x109   :  { %v147_v17 = vadd.f32 %v145_v13, %v50_v7 }
 0x10a   :  { %v146_v15 = vadd.f32 %v144_v14, %v49_v5 }
 0x10b   :  { %v151_v18 = vsel %vm62_vm0, %v147_v17, 0.0 }
 0x10c   :  { %v148_v16 = vsel %vm62_vm0, %v146_v15, 0.0 }
 0x10d   :  { %149 = vadd.xlane.f32.xlu0 %v148_v16 }
 0x111   :  { %152 = vadd.xlane.f32.xlu0 %v151_v18 }
 0x19a   :  { %v150_v19 = vpop.xlane.xlu0 %149 }
 0x19b   :  { %v154_v20 = vmul.f32 0.03125, %v150_v19 }
 0x19d   :  { %v156_v21 = vsub.f32 %v146_v15, %v154_v20 }
 0x19e   :  { %v153_v22 = vpop.xlane.xlu0 %152 }
 0x19f   :  { %v155_v23 = vmul.f32 0.03125, %v153_v22  ;;  %v158_v24 = vmul.f32 %v156_v21, %v156_v21 }
 0x1a1   :  { %v157_v25 = vsub.f32 %v147_v17, %v155_v23  ;;  %v160_v26 = vsel %vm62_vm0, %v158_v24, 0.0 }
 0x1a2   :  { %161 = vadd.xlane.f32.xlu1 %v160_v26 }
 0x1a3   :  { %v159_v27 = vmul.f32 %v157_v25, %v157_v25 }
 0x1a5   :  { %v163_v28 = vsel %vm62_vm0, %v159_v27, 0.0 }
 0x1a6   :  { %164 = vadd.xlane.f32.xlu1 %v163_v28 }
 0x22f   :  { %v162_v29 = vpop.xlane.xlu1 %161 }
 0x230   :  { %v166_v30 = vmul.f32 0.03125, %v162_v29 }
 0x232   :  { %v168_v31 = vadd.f32 1e-05, %v166_v30 }
 0x233   :  { %v165_v32 = vpop.xlane.xlu1 %164 }
 0x234   :  { %247 = vrsqrt.f32 %v168_v31  ;;  %v167_v33 = vmul.f32 0.03125, %v165_v32 }
 0x236   :  { %v169_v34 = vadd.f32 1e-05, %v167_v33 }
 0x238   :  { %249 = vrsqrt.f32 %v169_v34 }
 0x23e   :  { %v248_v35 = vpop.eup %247 }
 0x23f   :  { %v172_v37 = vmul.f32 %v248_v35, %v156_v21 }
 0x241   :  { %v181_v39 = vmul.f32 %v215_v36, %v172_v37 }
 0x242   :  { %v250_v40 = vpop.eup %249 }
 0x243   :  { %v173_v41 = vmul.f32 %v250_v40, %v157_v25  ;;  %v190_v42 = vadd.f32 %v216_v38, %v181_v39 }
 0x245   :  { %v182_v43 = vmul.f32 %v215_v36, %v173_v41  ;;  %192 = vst.msk [vmem:[#allocation7] sm:$0xff] %vm62_vm0, %v190_v42 }
 0x247   :  { %v191_v44 = vadd.f32 %v216_v38, %v182_v43 }
 0x249   :  { %193 = vst.msk [vmem:[#allocation7 + $0x8] sm:$0xff] %vm62_vm0, %v191_v44 }
 0x24a   :  { %306 = shalt.err (!%p303_p6)
}
 0x24b   :  { %s307_s25 = scalar_lea.hbm %s425_s5, 256 }
 0x24c   :  { %p308_p7 = scmp.ne.s32.totalorder %s425_s5, %s307_s25  ;;  %p311_p8 = scmp.lt.u32.totalorder %s307_s25, %s425_s5 }
 0x24e   :  { %p313_p9 = pnand %p311_p8, %p308_p7 }
 0x250   :  { %316 = shalt.err (!%p313_p9)
}
 0x251   :  { %205 = dma.vmem_to_hbm [thread:$0]  %s200_s23, 256, %s425_s5, [#allocation4], %s324_s28, %s324_s28, %s325_s29  }
 0x252   :  { %321 = dma.done.wait [#allocation4], 256  }
 0x253   :  { %322 = vsyncadd [#allocation4], 4294967040 }
 0x254   :  { %209 = vsyncpa [#allocation3], 1 }
 0x255   :  { %210 = vsyncpa [#allocation6], 1 }
 0x256   :  { %211 = vsyncpa [#allocation4], 1 }

</bundles_post_ra>
